<compile_context>
chip_gen: v5e
topology: v5e:2x2
jax: 0.10.0
libtpu: 0.0.40
codegen_flags: <defaults>
</compile_context>

<pallas_src>
import jax
import jax.numpy as jnp
from jax.experimental import pallas as pl
from jax.experimental.pallas import tpu as pltpu


def _round_up(x, m):
    return (x + m - 1) // m * m


# --------------------------------------------------------------------------- #
# Kernel body
# --------------------------------------------------------------------------- #
def _mlp_kernel(x_ref, wg_ref, wu_ref, wd_ref, o_ref, acc_ref):
    # x_ref:   (tm, H)      input rows (compute dtype, e.g. bf16)
    # wg_ref:  (H, ti)      gate_proj weight tile (transposed)
    # wu_ref:  (H, ti)      up_proj   weight tile (transposed)
    # wd_ref:  (ti, H)      down_proj weight tile (transposed)
    # o_ref:   (tm, H)      output tile (revisited across k)
    # acc_ref: (tm, H) f32  VMEM accumulator
    k = pl.program_id(1)

    @pl.when(k == 0)
    def _():
        acc_ref[...] = jnp.zeros_like(acc_ref)

    x = x_ref[...]
    # Two MXU pushes (same total FLOPs as a fused gate|up dot, no layout copy).
    gate = jnp.dot(x, wg_ref[...], preferred_element_type=jnp.float32)
    up = jnp.dot(x, wu_ref[...], preferred_element_type=jnp.float32)
    # SiLU (Qwen2 hidden_act = "silu") in f32; sigmoid lands on the EUP slot.
    h = (gate * jax.nn.sigmoid(gate)) * up
    # NOTE(precision): h is quantized to the compute dtype (bf16) before the
    # down_proj dot; accumulation stays f32. This is standard and is the reason
    # for the relaxed test tolerance vs. the f32 reference.
    acc_ref[...] += jnp.dot(h.astype(wd_ref.dtype), wd_ref[...],
                            preferred_element_type=jnp.float32)

    @pl.when(k == pl.num_programs(1) - 1)
    def _():
        o_ref[...] = acc_ref[...].astype(o_ref.dtype)


# --------------------------------------------------------------------------- #
# Weight preprocessing (do once at checkpoint load in production)
# --------------------------------------------------------------------------- #
def prepare_qwen2_mlp_weights(w_gate, w_up, w_down, compute_dtype=jnp.bfloat16):
    """Transpose + cast PyTorch nn.Linear weights for the kernel.

    w_gate, w_up: (I, H)  -> returned as (H, I)
    w_down:       (H, I)  -> returned as (I, H)

    TODO(synk): in production, call this once at checkpoint-load time and cache
    the results (and pre-quantize to fp8 on v7x / int8 on v5e-v6e for decode).
    """
    return (w_gate.T.astype(compute_dtype),
            w_up.T.astype(compute_dtype),
            w_down.T.astype(compute_dtype))


# --------------------------------------------------------------------------- #
# VMEM budget / tile selection
# --------------------------------------------------------------------------- #
def _physical_vmem_bytes():
    phys = 64 << 20  # conservative fallback (v7x per-TC size)
    try:
        info = pltpu.get_tpu_info()
        phys = int(getattr(info, "vmem_capacity_bytes", phys))
    except Exception:
        pass
    return phys


def _vmem_estimate(tm, ti, H, itemsize):
    # Double-buffered pipeline tiles: x, wg, wu, wd, out.
    pipeline = 2 * (tm * H + 2 * H * ti + ti * H + tm * H) * itemsize
    acc = tm * H * 4
    # Live compute intermediates: gate/up in f32 + h in compute dtype.
    interm = tm * ti * (2 * 4 + itemsize)
    return pipeline + acc + interm


# --------------------------------------------------------------------------- #
# Wrapper
# --------------------------------------------------------------------------- #
def qwen2_mlp_prepared(hidden_state, wg_t, wu_t, wd_t, *,
                       tm=None, ti=None, compute_dtype=jnp.bfloat16,
                       vmem_limit_bytes=None):
    """Qwen2 SwiGLU MLP forward with pre-transposed/cast weights.

    hidden_state: (B, S, H)
    wg_t, wu_t:   (H, I)   transposed gate/up weights (compute dtype)
    wd_t:         (I, H)   transposed down weight (compute dtype)
    """
    B, S, H = hidden_state.shape
    I = wg_t.shape[1]
    out_dtype = hidden_state.dtype
    M = B * S
    itemsize = jnp.dtype(compute_dtype).itemsize

    # ---- per-generation VMEM budget & default tiles. ----
    phys = _physical_vmem_bytes()
    budget = min(int(phys * 0.82), 100 << 20)   # ~52 MiB on v7x, ~100 MiB v5e/v6e
    auto_tm, auto_ti = tm is None, ti is None
    small_vmem = phys <= (80 << 20)             # v7x-class (64 MiB per TC)
    if auto_tm:
        tm = 512 if small_vmem else 768         # intensity ≈ tm flop/weight-byte
    if auto_ti:
        ti = 512 if small_vmem else 1024

    # ---- clamp to problem size; keep layout-friendly multiples. ----
    tm_eff = _round_up(min(tm, _round_up(M, 16)), 16)     # bf16 packs (16,128)
    ti_eff = _round_up(min(ti, _round_up(I, 128)), 128)   # keep lane-aligned

    # ---- shrink to VMEM budget: ti first (intensity depends on tm, not ti). ----
    if auto_ti:
        while _vmem_estimate(tm_eff, ti_eff, H, itemsize) > budget and ti_eff > 256:
            ti_eff = max(256, _round_up(ti_eff // 2, 128))
    if auto_tm:
        while _vmem_estimate(tm_eff, ti_eff, H, itemsize) > budget and tm_eff > 128:
            tm_eff = max(128, _round_up(tm_eff // 2, 16))

    m_pad = _round_up(M, tm_eff)
    i_pad = _round_up(I, ti_eff)
    nk = i_pad // ti_eff

    # ---- activations: flatten rows, cast once, pad ragged M. ----
    x2d = hidden_state.reshape(M, H).astype(compute_dtype)
    if m_pad != M:
        x2d = jnp.pad(x2d, ((0, m_pad - M), (0, 0)))

    # ---- weights: only pad if I is ragged w.r.t. ti (never true for real Qwen2
    #      sizes with power-of-two ti; avoids a per-call weight copy). ----
    if i_pad != I:
        wg_t = jnp.pad(wg_t, ((0, 0), (0, i_pad - I)))
        wu_t = jnp.pad(wu_t, ((0, 0), (0, i_pad - I)))
        wd_t = jnp.pad(wd_t, ((0, i_pad - I), (0, 0)))

    # ---- scoped VMEM limit. ----
    est = _vmem_estimate(tm_eff, ti_eff, H, itemsize)
    if vmem_limit_bytes is None:
        vmem_limit_bytes = int(min(max(int(est * 1.25), 32 << 20), budget))

    # ---- advisory cost estimate (helps XLA schedule surrounding ops). ----
    n_m_tiles = m_pad // tm_eff
    cost = pl.CostEstimate(
        flops=6 * M * I * H,
        transcendentals=M * I,
        bytes_accessed=int(n_m_tiles * 3 * I * H * itemsize
                           + 2 * M * H * itemsize),
    )

    grid = (n_m_tiles, nk)

    out2d = pl.pallas_call(
        _mlp_kernel,
        out_shape=jax.ShapeDtypeStruct((m_pad, H), out_dtype),
        grid_spec=pltpu.PrefetchScalarGridSpec(
            num_scalar_prefetch=0,
            grid=grid,
            in_specs=[
                pl.BlockSpec((tm_eff, H), lambda i, k: (i, 0)),      # x rows
                pl.BlockSpec((H, ti_eff), lambda i, k: (0, k)),      # gate_proj^T
                pl.BlockSpec((H, ti_eff), lambda i, k: (0, k)),      # up_proj^T
                pl.BlockSpec((ti_eff, H), lambda i, k: (k, 0)),      # down_proj^T
            ],
            out_specs=pl.BlockSpec((tm_eff, H), lambda i, k: (i, 0)),
            scratch_shapes=[pltpu.VMEM((tm_eff, H), jnp.float32)],
        ),
        compiler_params=pltpu.CompilerParams(
            dimension_semantics=("parallel", "arbitrary"),
            vmem_limit_bytes=vmem_limit_bytes,
        ),
        cost_estimate=cost,
    )(x2d, wg_t, wu_t, wd_t)

    # TODO(synk): for latency-critical decode on v7x, shard the k (I) axis
    # across the two TensorCores and combine partial accumulators (CMEM +
    # core_barrier) instead of relying on the M-parallel axis alone.

    if m_pad != M:
        out2d = out2d[:M]
    return out2d.reshape(B, S, H)


def qwen2_mlp(hidden_state, w_gate, w_up, w_down, *,
              tm=None, ti=None, compute_dtype=jnp.bfloat16,
              vmem_limit_bytes=None):
    """Convenience wrapper taking PyTorch nn.Linear-layout weights.

    hidden_state: (B, S, H)
    w_gate, w_up: (I, H)   (out_features, in_features), bias=False
    w_down:       (H, I)
    """
    wg_t, wu_t, wd_t = prepare_qwen2_mlp_weights(w_gate, w_up, w_down,
                                                 compute_dtype)
    return qwen2_mlp_prepared(hidden_state, wg_t, wu_t, wd_t,
                              tm=tm, ti=ti, compute_dtype=compute_dtype,
                              vmem_limit_bytes=vmem_limit_bytes)


# --------------------------------------------------------------------------- #
# Reference & test
# --------------------------------------------------------------------------- #
def _reference(hidden_state, w_gate, w_up, w_down):
    g = jnp.einsum("bsh,ih->bsi", hidden_state, w_gate)
    u = jnp.einsum("bsh,ih->bsi", hidden_state, w_up)
    h = jax.nn.silu(g) * u
    return jnp.einsum("bsi,hi->bsh", h, w_down)


if __name__ == "__main__":
    # Small synthetic config consistent with Qwen2MLP:
    #   hidden_size=32, intermediate_size=64, batch=2, seq=8
    B, S, H, I = 2, 8, 32, 64

    key = jax.random.PRNGKey(0)
    kx, kg, ku, kd = jax.random.split(key, 4)

    x = jax.random.normal(kx, (B, S, H), dtype=jnp.float32)
    # nn.Linear default layout: (out_features, in_features), bias=False
    w_gate = jax.random.normal(kg, (I, H), dtype=jnp.float32) * 0.05
    w_up = jax.random.normal(ku, (I, H), dtype=jnp.float32) * 0.05
    w_down = jax.random.normal(kd, (H, I), dtype=jnp.float32) * 0.05

    out = qwen2_mlp(x, w_gate, w_up, w_down)
    out = jax.block_until_ready(out)

    ref = _reference(x, w_gate, w_up, w_down)
    assert out.shape == (B, S, H)
    assert not bool(jnp.any(jnp.isnan(out)))
    # bf16 compute (f32 accumulation) vs f32 reference -> relaxed tolerance.
    assert jnp.allclose(out, ref, atol=2e-2, rtol=2e-2), (
        float(jnp.max(jnp.abs(out - ref))))

    print("KERNEL_OK")
</pallas_src>

<mosaic_0001>
module attributes {stable_mosaic.version = 11 : i64} {
  func.func @_mlp_kernel(%arg0: i32, %arg1: i32, %arg2: memref<16x32xbf16, #tpu.memory_space<vmem>>, %arg3: memref<32x128xbf16, #tpu.memory_space<vmem>>, %arg4: memref<32x128xbf16, #tpu.memory_space<vmem>>, %arg5: memref<128x32xbf16, #tpu.memory_space<vmem>>, %arg6: memref<16x32xf32, #tpu.memory_space<vmem>>, %arg7: memref<16x32xf32, #tpu.memory_space<vmem>>) attributes {dimension_semantics = [#tpu.dimension_semantics<parallel>, #tpu.dimension_semantics<arbitrary>], iteration_bounds = array<i64: 1, 1>, scalar_prefetch = 0 : i64, scratch_operands = 1 : i64, tpu.core_type = #tpu.core_type<tc>, window_params = [{transform_indices = @transform_0, window_bounds = array<i64: 16, 32>}, {transform_indices = @transform_1, window_bounds = array<i64: 32, 128>}, {transform_indices = @transform_2, window_bounds = array<i64: 32, 128>}, {transform_indices = @transform_3, window_bounds = array<i64: 128, 32>}, {transform_indices = @transform_4, window_bounds = array<i64: 16, 32>}]} {
    %c0_i32 = arith.constant 0 : i32
    %0 = arith.cmpi eq, %arg1, %c0_i32 : i32
    %1 = arith.extui %0 : i1 to i32
    %c0_i32_0 = arith.constant 0 : i32
    %2 = arith.cmpi ne, %1, %c0_i32_0 : i32
    scf.if %2 {
      %cst_17 = arith.constant 0.000000e+00 : f32
      %24 = vector.broadcast %cst_17 : f32 to vector<16x32xf32>
      %c0_18 = arith.constant 0 : index
      %c0_19 = arith.constant 0 : index
      %25 = vector.load %arg7[%c0_18, %c0_19] : memref<16x32xf32, #tpu.memory_space<vmem>>, vector<16x32xf32>
      tpu.vector_store %arg7[%c0_18, %c0_19], %24 {strides = array<i32>} : memref<16x32xf32, #tpu.memory_space<vmem>>, vector<16x32xf32>,
    } else {
    }
    %c0 = arith.constant 0 : index
    %c0_1 = arith.constant 0 : index
    %3 = vector.load %arg2[%c0, %c0_1] : memref<16x32xbf16, #tpu.memory_space<vmem>>, vector<16x32xbf16>
    %c0_2 = arith.constant 0 : index
    %c0_3 = arith.constant 0 : index
    %4 = vector.load %arg3[%c0_2, %c0_3] : memref<32x128xbf16, #tpu.memory_space<vmem>>, vector<32x128xbf16>
    %cst = arith.constant dense<0.000000e+00> : vector<16x128xf32>
    %5 = tpu.matmul %3, %4, %cst {dimension_numbers = #tpu.dot_dimension_numbers<[1], [0], [0], [1], [0, 0, 1, 1], [], []>} : vector<16x32xbf16>, vector<32x128xbf16>, vector<16x128xf32> -> vector<16x128xf32>
    %c0_4 = arith.constant 0 : index
    %c0_5 = arith.constant 0 : index
    %6 = vector.load %arg4[%c0_4, %c0_5] : memref<32x128xbf16, #tpu.memory_space<vmem>>, vector<32x128xbf16>
    %cst_6 = arith.constant dense<0.000000e+00> : vector<16x128xf32>
    %7 = tpu.matmul %3, %6, %cst_6 {dimension_numbers = #tpu.dot_dimension_numbers<[1], [0], [0], [1], [0, 0, 1, 1], [], []>} : vector<16x32xbf16>, vector<32x128xbf16>, vector<16x128xf32> -> vector<16x128xf32>
    %8 = arith.negf %5 : vector<16x128xf32>
    %9 = math.exp %8 : vector<16x128xf32>
    %cst_7 = arith.constant 1.000000e+00 : f32
    %10 = vector.broadcast %cst_7 : f32 to vector<16x128xf32>
    %11 = arith.addf %10, %9 : vector<16x128xf32>
    %12 = arith.divf %10, %11 : vector<16x128xf32>
    %13 = arith.mulf %5, %12 : vector<16x128xf32>
    %14 = arith.mulf %13, %7 : vector<16x128xf32>
    %c0_8 = arith.constant 0 : index
    %c0_9 = arith.constant 0 : index
    %15 = vector.load %arg7[%c0_8, %c0_9] : memref<16x32xf32, #tpu.memory_space<vmem>>, vector<16x32xf32>
    %16 = arith.truncf %14 : vector<16x128xf32> to vector<16x128xbf16>
    %c0_10 = arith.constant 0 : index
    %c0_11 = arith.constant 0 : index
    %17 = vector.load %arg5[%c0_10, %c0_11] : memref<128x32xbf16, #tpu.memory_space<vmem>>, vector<128x32xbf16>
    %cst_12 = arith.constant dense<0.000000e+00> : vector<16x32xf32>
    %18 = tpu.matmul %16, %17, %cst_12 {dimension_numbers = #tpu.dot_dimension_numbers<[1], [0], [0], [1], [0, 0, 1, 1], [], []>} : vector<16x128xbf16>, vector<128x32xbf16>, vector<16x32xf32> -> vector<16x32xf32>
    %19 = arith.addf %15, %18 : vector<16x32xf32>
    %c0_13 = arith.constant 0 : index
    %c0_14 = arith.constant 0 : index
    %20 = vector.load %arg7[%c0_13, %c0_14] : memref<16x32xf32, #tpu.memory_space<vmem>>, vector<16x32xf32>
    tpu.vector_store %arg7[%c0_13, %c0_14], %19 {strides = array<i32>} : memref<16x32xf32, #tpu.memory_space<vmem>>, vector<16x32xf32>,
    %c0_i32_15 = arith.constant 0 : i32
    %21 = arith.cmpi eq, %arg1, %c0_i32_15 : i32
    %22 = arith.extui %21 : i1 to i32
    %c0_i32_16 = arith.constant 0 : i32
    %23 = arith.cmpi ne, %22, %c0_i32_16 : i32
    scf.if %23 {
      %c0_17 = arith.constant 0 : index
      %c0_18 = arith.constant 0 : index
      %24 = vector.load %arg7[%c0_17, %c0_18] : memref<16x32xf32, #tpu.memory_space<vmem>>, vector<16x32xf32>
      %c0_19 = arith.constant 0 : index
      %c0_20 = arith.constant 0 : index
      %25 = vector.load %arg6[%c0_19, %c0_20] : memref<16x32xf32, #tpu.memory_space<vmem>>, vector<16x32xf32>
      tpu.vector_store %arg6[%c0_19, %c0_20], %24 {strides = array<i32>} : memref<16x32xf32, #tpu.memory_space<vmem>>, vector<16x32xf32>,
    } else {
    }
    return
  }
  func.func @transform_0(%arg0: i32, %arg1: i32) -> (i32, i32) {
    %c0_i32 = arith.constant 0 : i32
    %c0_i32_0 = arith.constant 0 : i32
    return %arg0, %c0_i32 : i32, i32
  }
  func.func @transform_1(%arg0: i32, %arg1: i32) -> (i32, i32) {
    %c0_i32 = arith.constant 0 : i32
    %c0_i32_0 = arith.constant 0 : i32
    return %c0_i32, %arg1 : i32, i32
  }
  func.func @transform_2(%arg0: i32, %arg1: i32) -> (i32, i32) {
    %c0_i32 = arith.constant 0 : i32
    %c0_i32_0 = arith.constant 0 : i32
    return %c0_i32, %arg1 : i32, i32
  }
  func.func @transform_3(%arg0: i32, %arg1: i32) -> (i32, i32) {
    %c0_i32 = arith.constant 0 : i32
    %c0_i32_0 = arith.constant 0 : i32
    return %arg1, %c0_i32 : i32, i32
  }
  func.func @transform_4(%arg0: i32, %arg1: i32) -> (i32, i32) {
    %c0_i32 = arith.constant 0 : i32
    %c0_i32_0 = arith.constant 0 : i32
    return %arg0, %c0_i32 : i32, i32
  }
}

</mosaic_0001>

<bundles_post_ra>
// kernel: tpu_custom_call.1
= control target key start
LH: loop header
LB: loop body
LE: loop exit
PB: predicated region body
PF: predicated region fallthrough
CT: control target
= control target key end

     0   :  { %s435_s0 = inlined_call_operand.vmem [shape: bf16[16,32], index: 0, kind: input, shape index: {}]   ;;  %s436_s1 = inlined_call_operand.vmem [shape: bf16[32,128], index: 1, kind: input, shape index: {}]   ;;  %s437_s2 = inlined_call_operand.vmem [shape: bf16[32,128], index: 2, kind: input, shape index: {}]   ;;  %s438_s3 = inlined_call_operand.vmem [shape: bf16[128,32], index: 3, kind: input, shape index: {}]   ;;  %s439_s4 = inlined_call_operand.hbm [shape: f32[16,32], index: 4, kind: output, shape index: {}]  }
   0x1   :  { %v307_v0 = vld [vmem:[%s436_s1 + $0x8] sm:$0xff] }
   0x2   :  { %v309_v1 = vld [vmem:[%s437_s2 + $0x8] sm:$0xff] }
   0x3   :  { %9 = vsyncpa [#allocation4], 0  ;;  %59 = vmatpush.bf16.msra.mxu0 %v307_v0  ;;  %v306_v2 = vld [vmem:[%s436_s1] sm:$0xff]  ;;  %89 = vmatpush.bf16.msra.mxu1 %v309_v1  ;;  %vm23_vm0 = vcmask 261120   ;;  %v317_v5 = vld [vmem:[%s438_s3 + $0x38] sm:$0xff]  ;;  %v356_v19 = vmov 0.0  }
   0x4   :  { %v308_v3 = vld [vmem:[%s437_s2] sm:$0xff]  ;;  %206 = vmatpush.bf16.msra.mxu2 %v317_v5  ;;  %v316_v6 = vld [vmem:[%s438_s3 + $0x30] sm:$0xff]  ;;  %v315_v7 = vld [vmem:[%s438_s3 + $0x28] sm:$0xff]  ;;  %24 = vst.msk [vmem:[#allocation2] sm:$0xff] %vm23_vm0, %v356_v19  ;;  %s237_s15 = sshll.u32 %s439_s4, 4  ;;  %s358_s16 = smov 128   ;;  %s238_s15 = int_to_ptr.hbm [resolvable:$true] %s237_s15 }
   0x5   :  { %v305_v4 = vld [vmem:[%s435_s0] sm:$0xff]  ;;  %v313_v9 = vld [vmem:[%s438_s3 + $0x18] sm:$0xff]  ;;  %v312_v10 = vld [vmem:[%s438_s3 + $0x10] sm:$0xff]  ;;  %25 = vst.msk [vmem:[#allocation2 + $0x8] sm:$0xff] %vm23_vm0, %v356_v19  ;;  %s359_s17 = smov 8  }
   0x6   :  { %v314_v8 = vld [vmem:[%s438_s3 + $0x20] sm:$0xff]  ;;  %v311_v13 = vld [vmem:[%s438_s3 + $0x8] sm:$0xff] }
   0x7   :  { %60 = vmatpush.bf16.msra.mxu0 %v306_v2  ;;  %90 = vmatpush.bf16.msra.mxu1 %v308_v3  ;;  %v310_v14 = vld [vmem:[%s438_s3] sm:$0xff]  ;;  %s357_s3 = smov [#allocation3]  }
   0x8   :  { %207 = vmatpush.bf16.msra.mxu2 %v316_v6  ;;  %s235_s12 = sshll.u32 %s357_s3, 4  ;;  %s236_s12 = int_to_ptr.vmem [resolvable:$true] %s235_s12 }
   0xa   :  { %261 = vmatmul.msk.bf16.vlgmr.msra.gmra.mxu0 %vm23_vm0, %v305_v4  ;;  %270 = vmatmul.msk.bf16.vlgmr.msra.gmra.mxu1 %vm23_vm0, %v305_v4 }
   0xb   :  { %v139_v49 = vld [vmem:[#allocation2] sm:$0xff] }
   0xc   :  { %208 = vmatpush.bf16.msra.mxu2 %v315_v7  ;;  %v140_v52 = vld [vmem:[#allocation2 + $0x8] sm:$0xff] }
  0x10   :  { %209 = vmatpush.bf16.msra.mxu2 %v314_v8 }
  0x14   :  { %210 = vmatpush.bf16.msra.mxu2 %v313_v9 }
  0x18   :  { %211 = vmatpush.bf16.msra.mxu2 %v312_v10 }
  0x1c   :  { %212 = vmatpush.bf16.msra.mxu2 %v311_v13 }
  0x20   :  { %213 = vmatpush.bf16.msra.mxu2 %v310_v14 }
  0x87   :  { %v62_v11 = vpop.f32.mrf.mxu0  ;;  %v92_v31 = vpop.f32.mrf.mxu1 }
  0x88   :  { %v271_v12 = vmul.f32 -1.442695, %v62_v11 }
  0x8a   :  { %322 = vpow2.f32 %v271_v12 }
  0x8f   :  { %v64_v15 = vpop.f32.mrf.mxu0  ;;  %v94_v45 = vpop.f32.mrf.mxu1 }
  0x90   :  { %v323_v16 = vpop.eup %322  ;;  %v272_v17 = vmul.f32 -1.442695, %v64_v15 }
  0x91   :  { %v103_v18 = vadd.f32 1.0, %v323_v16 }
  0x92   :  { %324 = vpow2.f32 %v272_v17 }
  0x93   :  { %326 = vrcp.f32 %v103_v18  ;;  %v116_v28 = vand.u32 2147483648, %v103_v18  ;;  %vm110_vm2 = vweird.f32 %v103_v18  ;;  %v114_v29 = vand.u32 2147483647, %v103_v18 }
  0x95   :  { %v117_v34 = vor.u32 1.1754944e-38, %v116_v28  ;;  %vm115_vm4 = vcmp.eq.f32.partialorder %v114_v29, 8.507059e+37 }
  0x98   :  { %v325_v20 = vpop.eup %324 }
  0x99   :  { %v327_v21 = vpop.eup %326  ;;  %v104_v22 = vadd.f32 1.0, %v325_v20 }
  0x9a   :  { %v106_v23 = vmul.f32 %v327_v21, %v103_v18  ;;  %vm111_vm1 = vweird.f32 %v327_v21 }
  0x9b   :  { %328 = vrcp.f32 %v104_v22  ;;  %vm112_vm3 = vmor %vm110_vm2, %vm111_vm1  ;;  %v131_v35 = vand.u32 2147483648, %v104_v22  ;;  %v129_v37 = vand.u32 2147483647, %v104_v22  ;;  %vm125_vm6 = vweird.f32 %v104_v22 }
  0x9c   :  { %v107_v24 = vsub.f32 1.0, %v106_v23 }
  0x9d   :  { %v132_v40 = vor.u32 1.1754944e-38, %v131_v35  ;;  %vm130_vm8 = vcmp.eq.f32.partialorder %v129_v37, 8.507059e+37 }
  0x9e   :  { %v108_v25 = vmul.f32 %v327_v21, %v107_v24 }
  0xa0   :  { %v109_v26 = vadd.f32 %v327_v21, %v108_v25 }
  0xa1   :  { %v329_v27 = vpop.eup %328 }
  0xa2   :  { %v121_v30 = vmul.f32 %v329_v27, %v104_v22  ;;  %v113_v32 = vsel %vm112_vm3, %v327_v21, %v109_v26  ;;  %vm126_vm5 = vweird.f32 %v329_v27 }
  0xa3   :  { %v118_v38 = vsel %vm115_vm4, %v117_v34, %v113_v32  ;;  %vm127_vm7 = vmor %vm125_vm6, %vm126_vm5 }
  0xa4   :  { %v122_v33 = vsub.f32 1.0, %v121_v30  ;;  %v135_v41 = vmul.f32 %v118_v38, %v62_v11 }
  0xa6   :  { %v123_v36 = vmul.f32 %v329_v27, %v122_v33  ;;  %v137_v46 = vmul.f32 %v135_v41, %v92_v31 }
  0xa8   :  { %v124_v39 = vadd.f32 %v329_v27, %v123_v36 }
  0xaa   :  { %v128_v42 = vsel %vm127_vm7, %v329_v27, %v124_v39 }
  0xab   :  { %v133_v43 = vsel %vm130_vm8, %v132_v40, %v128_v42 }
  0xac   :  { %v136_v44 = vmul.f32 %v133_v43, %v64_v15 }
  0xae   :  { %v138_v47 = vmul.f32 %v136_v44, %v94_v45 }
  0xb0   :  { %v141_v48 = vpack.c.bf16 %v138_v47, %v137_v46 }
  0xb2   :  { %214 = vmatmul.bf16.vlgmr.msra.gmra.mxu2 %v141_v48 }
 0x135   :  { %v215_v50 = vpop.f32.mrf.mxu2 }
 0x136   :  { %v220_v51 = vadd.f32 %v215_v50, %v139_v49 }
 0x138   :  { %222 = vst.msk [vmem:[#allocation2] sm:$0xff] %vm23_vm0, %v220_v51 }
 0x13d   :  { %v217_v53 = vpop.f32.mrf.mxu2 }
 0x13e   :  { %v221_v54 = vadd.f32 %v217_v53, %v140_v52 }
 0x13f   :  { %v227_v55 = vld [vmem:[#allocation2] sm:$0xff] }
 0x140   :  { %223 = vst.msk [vmem:[#allocation2 + $0x8] sm:$0xff] %vm23_vm0, %v221_v54 }
 0x141   :  { %229 = vst.msk [vmem:[#allocation3] sm:$0xff] %vm23_vm0, %v227_v55 }
 0x147   :  { %v228_v56 = vld [vmem:[#allocation2 + $0x8] sm:$0xff] }
 0x148   :  { %230 = vst.msk [vmem:[#allocation3 + $0x8] sm:$0xff] %vm23_vm0, %v228_v56 }
 0x149   :  { %243 = dma.vmem_to_hbm [thread:$0]  %s236_s12, 256, %s238_s15, [#allocation4], %s358_s16, %s358_s16, %s359_s17  }
 0x14a   :  { %354 = dma.done.wait [#allocation4], 256  }
 0x14b   :  { %355 = vsyncadd [#allocation4], 4294967040 }
 0x14c   :  { %248 = vsyncpa [#allocation4], 1 }

</bundles_post_ra>
